<compile_context>
chip_gen: v5e
topology: v5e:2x2
jax: 0.10.0
libtpu: 0.0.40
codegen_flags: <defaults>
</compile_context>

<pallas_src>
import jax
import jax.numpy as jnp
from jax.experimental import pallas as pl
from jax.experimental.pallas import tpu as pltpu


def conv2d_pallas(x_nchw, weight, bias):
    """Equivalent of nn.Conv2d(3, 6, kernel_size=3, stride=1, padding=0).

    x_nchw: (N, Cin, H, W) float32
    weight: (Cout, Cin, KH, KW) float32   (PyTorch OIHW layout)
    bias:   (Cout,) float32
    returns (N, Cout, Ho, Wo) float32
    """
    n, cin, h, w = x_nchw.shape
    cout, cin_w, kh, kw = weight.shape
    assert cin == cin_w
    ho, wo = h - kh + 1, w - kw + 1
    hw = h * w                      # 256  -> lane dim, exact multiple of 128
    nhw = n * hw                    # 512
    k = cin * kh * kw               # 27

    def kernel(x_ref, w_ref, b_ref, o_ref):
        # x_ref: (N, Cin, HW)   lane-dense flattened NCHW input
        # w_ref: (Cout, K)      weight, tap-major columns: (i*KW + j)*Cin + c
        # b_ref: (Cout, 1)      broadcasts along the lane axis
        # o_ref: (N, Cout, HW)  lane-dense output (border pixels are garbage)

        # Put the batch along lanes: (Cin, N*HW); 256 is a lane-tile boundary.
        xcat = jnp.concatenate([x_ref[nb] for nb in range(n)], axis=-1)

        # In-kernel im2col: one cheap XLU lane rotation per nonzero tap offset.
        # Tap value at output pixel p is x[p + i*W + j] -> roll by -(i*W + j).
        taps = []
        for i in range(kh):
            for j in range(kw):
                off = i * w + j
                if off == 0:
                    taps.append(xcat)
                else:
                    taps.append(pltpu.roll(xcat, shift=nhw - off, axis=1))
        patches = jnp.concatenate(taps, axis=0)          # (K, N*HW) = (27, 512)

        # One fused MXU matmul for the whole batch, then bias on the VPU.
        acc = jnp.dot(w_ref[...], patches,
                      preferred_element_type=jnp.float32)  # (Cout, N*HW)
        acc = acc + b_ref[...]

        for nb in range(n):                               # tiny static batch
            o_ref[nb] = acc[:, nb * hw:(nb + 1) * hw].astype(o_ref.dtype)

    # Wrapper side: only free / tiny reshapes (no im2col, no HBM intermediate).
    x_flat = x_nchw.reshape(n, cin, hw)                        # contiguous, free
    w_flat = jnp.transpose(weight, (0, 2, 3, 1)).reshape(cout, k)  # 648 B
    b_col = bias.reshape(cout, 1)

    out = pl.pallas_call(
        kernel,
        out_shape=jax.ShapeDtypeStruct((n, cout, hw), x_nchw.dtype),
        grid_spec=pl.GridSpec(
            grid=(1,),                                   # whole problem, 1 step
            in_specs=[
                pl.BlockSpec((n, cin, hw), lambda i: (0, 0, 0)),
                pl.BlockSpec((cout, k), lambda i: (0, 0)),
                pl.BlockSpec((cout, 1), lambda i: (0, 0)),
            ],
            out_specs=pl.BlockSpec((n, cout, hw), lambda i: (0, 0, 0)),
        ),
    )(x_flat, w_flat, b_col)

    # Free reshape back to the full NCHW grid, then drop the wrapped border
    # rows/cols (only garbage lives there; valid pixels are exact).
    return out.reshape(n, cout, h, w)[:, :, :ho, :wo]


def _reference_conv(x_nchw, weight, bias):
    out = jax.lax.conv_general_dilated(
        x_nchw, weight, window_strides=(1, 1), padding="VALID",
        dimension_numbers=("NCHW", "OIHW", "NCHW"))
    return out + bias.reshape(1, -1, 1, 1)


if __name__ == "__main__":
    key = jax.random.PRNGKey(0)
    k_x, k_w, k_b = jax.random.split(key, 3)

    # Small shapes consistent with the module: N=2, Cin=3, H=W=16.
    x = jax.random.normal(k_x, (2, 3, 16, 16), dtype=jnp.float32)

    # Deterministic parameter init (shapes from nn.Conv2d(3, 6, 3)).
    cout, cin, kh, kw = 6, 3, 3, 3
    fan_in = cin * kh * kw
    bound = 1.0 / (fan_in ** 0.5)
    weight = jax.random.uniform(k_w, (cout, cin, kh, kw),
                                minval=-bound, maxval=bound,
                                dtype=jnp.float32)
    bias = jax.random.uniform(k_b, (cout,), minval=-bound, maxval=bound,
                              dtype=jnp.float32)

    out = conv2d_pallas(x, weight, bias)
    out = jax.block_until_ready(out)

    ref = _reference_conv(x, weight, bias)
    assert out.shape == (2, 6, 14, 14)
    assert jnp.allclose(out, ref, atol=1e-4, rtol=1e-4)

    print("KERNEL_OK")
</pallas_src>

<mosaic_0001>
module attributes {stable_mosaic.version = 11 : i64} {
  func.func @kernel(%arg0: i32, %arg1: memref<2x3x256xf32, #tpu.memory_space<vmem>>, %arg2: memref<6x27xf32, #tpu.memory_space<vmem>>, %arg3: memref<6x1xf32, #tpu.memory_space<vmem>>, %arg4: memref<2x6x256xf32, #tpu.memory_space<vmem>>) attributes {dimension_semantics = [#tpu.dimension_semantics<arbitrary>], iteration_bounds = array<i64: 1>, scalar_prefetch = 0 : i64, scratch_operands = 0 : i64, tpu.core_type = #tpu.core_type<tc>, window_params = [{pipeline_mode = #tpu.pipeline_mode<synchronous>, transform_indices = @transform_0, window_bounds = array<i64: 2, 3, 256>}, {pipeline_mode = #tpu.pipeline_mode<synchronous>, transform_indices = @transform_1, window_bounds = array<i64: 6, 27>}, {pipeline_mode = #tpu.pipeline_mode<synchronous>, transform_indices = @transform_2, window_bounds = array<i64: 6, 1>}, {pipeline_mode = #tpu.pipeline_mode<synchronous>, transform_indices = @transform_3, window_bounds = array<i64: 2, 6, 256>}]} {
    %c0 = arith.constant 0 : index
    %c0_0 = arith.constant 0 : index
    %c0_1 = arith.constant 0 : index
    %0 = vector.load %arg1[%c0, %c0_0, %c0_1] : memref<2x3x256xf32, #tpu.memory_space<vmem>>, vector<1x3x256xf32>
    %1 = vector.shape_cast %0 : vector<1x3x256xf32> to vector<3x256xf32>
    %c1 = arith.constant 1 : index
    %c0_2 = arith.constant 0 : index
    %c0_3 = arith.constant 0 : index
    %2 = vector.load %arg1[%c1, %c0_2, %c0_3] : memref<2x3x256xf32, #tpu.memory_space<vmem>>, vector<1x3x256xf32>
    %3 = vector.shape_cast %2 : vector<1x3x256xf32> to vector<3x256xf32>
    %4 = tpu.concatenate %1, %3 in 1 : vector<3x256xf32>, vector<3x256xf32> -> vector<3x512xf32>
    %c511_i32 = arith.constant 511 : i32
    %5 = tpu.dynamic_rotate %4 by %c511_i32 dim 1 : vector<3x512xf32>, i32 -> vector<3x512xf32>
    %c510_i32 = arith.constant 510 : i32
    %6 = tpu.dynamic_rotate %4 by %c510_i32 dim 1 : vector<3x512xf32>, i32 -> vector<3x512xf32>
    %c496_i32 = arith.constant 496 : i32
    %7 = tpu.dynamic_rotate %4 by %c496_i32 dim 1 : vector<3x512xf32>, i32 -> vector<3x512xf32>
    %c495_i32 = arith.constant 495 : i32
    %8 = tpu.dynamic_rotate %4 by %c495_i32 dim 1 : vector<3x512xf32>, i32 -> vector<3x512xf32>
    %c494_i32 = arith.constant 494 : i32
    %9 = tpu.dynamic_rotate %4 by %c494_i32 dim 1 : vector<3x512xf32>, i32 -> vector<3x512xf32>
    %c480_i32 = arith.constant 480 : i32
    %10 = tpu.dynamic_rotate %4 by %c480_i32 dim 1 : vector<3x512xf32>, i32 -> vector<3x512xf32>
    %c479_i32 = arith.constant 479 : i32
    %11 = tpu.dynamic_rotate %4 by %c479_i32 dim 1 : vector<3x512xf32>, i32 -> vector<3x512xf32>
    %c478_i32 = arith.constant 478 : i32
    %12 = tpu.dynamic_rotate %4 by %c478_i32 dim 1 : vector<3x512xf32>, i32 -> vector<3x512xf32>
    %13 = tpu.concatenate %4, %5, %6, %7, %8, %9, %10, %11, %12 in 0 : vector<3x512xf32>, vector<3x512xf32>, vector<3x512xf32>, vector<3x512xf32>, vector<3x512xf32>, vector<3x512xf32>, vector<3x512xf32>, vector<3x512xf32>, vector<3x512xf32> -> vector<27x512xf32>
    %c0_4 = arith.constant 0 : index
    %c0_5 = arith.constant 0 : index
    %14 = vector.load %arg2[%c0_4, %c0_5] : memref<6x27xf32, #tpu.memory_space<vmem>>, vector<6x27xf32>
    %cst = arith.constant dense<0.000000e+00> : vector<6x512xf32>
    %15 = tpu.matmul %14, %13, %cst {dimension_numbers = #tpu.dot_dimension_numbers<[1], [0], [0], [1], [0, 0, 1, 1], [], []>} : vector<6x27xf32>, vector<27x512xf32>, vector<6x512xf32> -> vector<6x512xf32>
    %c0_6 = arith.constant 0 : index
    %c0_7 = arith.constant 0 : index
    %16 = vector.load %arg3[%c0_6, %c0_7] : memref<6x1xf32, #tpu.memory_space<vmem>>, vector<6x1xf32>
    %17 = vector.broadcast %16 : vector<6x1xf32> to vector<6x512xf32>
    %18 = arith.addf %15, %17 : vector<6x512xf32>
    %19 = vector.extract_strided_slice %18 {offsets = [0, 0], sizes = [6, 256], strides = [1, 1]} : vector<6x512xf32> to vector<6x256xf32>
    %c0_8 = arith.constant 0 : index
    %c0_9 = arith.constant 0 : index
    %c0_10 = arith.constant 0 : index
    %20 = vector.load %arg4[%c0_8, %c0_9, %c0_10] : memref<2x6x256xf32, #tpu.memory_space<vmem>>, vector<1x6x256xf32>
    %21 = vector.shape_cast %20 : vector<1x6x256xf32> to vector<6x256xf32>
    %22 = vector.shape_cast %19 : vector<6x256xf32> to vector<1x6x256xf32>
    tpu.vector_store %arg4[%c0_8, %c0_9, %c0_10], %22 {strides = array<i32>} : memref<2x6x256xf32, #tpu.memory_space<vmem>>, vector<1x6x256xf32>,
    %23 = vector.extract_strided_slice %18 {offsets = [0, 256], sizes = [6, 256], strides = [1, 1]} : vector<6x512xf32> to vector<6x256xf32>
    %c1_11 = arith.constant 1 : index
    %c0_12 = arith.constant 0 : index
    %c0_13 = arith.constant 0 : index
    %24 = vector.load %arg4[%c1_11, %c0_12, %c0_13] : memref<2x6x256xf32, #tpu.memory_space<vmem>>, vector<1x6x256xf32>
    %25 = vector.shape_cast %24 : vector<1x6x256xf32> to vector<6x256xf32>
    %26 = vector.shape_cast %23 : vector<6x256xf32> to vector<1x6x256xf32>
    tpu.vector_store %arg4[%c1_11, %c0_12, %c0_13], %26 {strides = array<i32>} : memref<2x6x256xf32, #tpu.memory_space<vmem>>, vector<1x6x256xf32>,
    return
  }
  func.func @transform_0(%arg0: i32) -> (i32, i32, i32) {
    %c0_i32 = arith.constant 0 : i32
    %c0_i32_0 = arith.constant 0 : i32
    %c0_i32_1 = arith.constant 0 : i32
    %c0_i32_2 = arith.constant 0 : i32
    return %c0_i32, %c0_i32_0, %c0_i32_1 : i32, i32, i32
  }
  func.func @transform_1(%arg0: i32) -> (i32, i32) {
    %c0_i32 = arith.constant 0 : i32
    %c0_i32_0 = arith.constant 0 : i32
    %c0_i32_1 = arith.constant 0 : i32
    return %c0_i32, %c0_i32_0 : i32, i32
  }
  func.func @transform_2(%arg0: i32) -> (i32, i32) {
    %c0_i32 = arith.constant 0 : i32
    %c0_i32_0 = arith.constant 0 : i32
    %c0_i32_1 = arith.constant 0 : i32
    return %c0_i32, %c0_i32_0 : i32, i32
  }
  func.func @transform_3(%arg0: i32) -> (i32, i32, i32) {
    %c0_i32 = arith.constant 0 : i32
    %c0_i32_0 = arith.constant 0 : i32
    %c0_i32_1 = arith.constant 0 : i32
    %c0_i32_2 = arith.constant 0 : i32
    return %c0_i32, %c0_i32_0, %c0_i32_1 : i32, i32, i32
  }
}

</mosaic_0001>

<bundles_post_ra>
// kernel: tpu_custom_call.1
= control target key start
LH: loop header
LB: loop body
LE: loop exit
PB: predicated region body
PF: predicated region fallthrough
CT: control target
= control target key end

     0   :  { %s453_s16 = smov 96   ;;  %s454_s17 = smov 110   ;;  %v37_v13 = vlaneseq  ;;  %vm244_vm4 = vcmask 1041408   ;;  %vm229_vm7 = vcmask 1040384   ;;  %vm219_vm9 = vcmask 1042432   ;;  %s706_s0 = inlined_call_operand.vmem [shape: f32[2,3,256], index: 0, kind: input, shape index: {}]   ;;  %s707_s2 = inlined_call_operand.vmem [shape: f32[6,1], index: 2, kind: input, shape index: {}]   ;;  %s708_s1 = inlined_call_operand.vmem [shape: f32[6,27], index: 1, kind: input, shape index: {}]   ;;  %s709_s3 = inlined_call_operand.vmem [shape: f32[2,6,256], index: 3, kind: output, shape index: {}]  }
   0x1   :  { %v14_v0 = vld [vmem:[%s706_s0] sm:$0x77]  ;;  %v366_v1 = vld [vmem:[%s706_s0 + $0x8] sm:$0x77]  ;;  %s455_s18 = smov 126   ;;  %s456_s0 = smov 112  }
   0x2   :  { %18 = vst [vmem:[#allocation1] ss:$2 sm:$0xff] %v14_v0  ;;  %s457_s19 = smov 95   ;;  %s458_s20 = smov 111   ;;  %v508_v14 = vand.u32 127, %v37_v13  ;;  %vm234_vm10 = vcmask 1043456  }
   0x3   :  { %s459_s21 = smov 94   ;;  %s460_s22 = smov 127   ;;  %vm249_vm11 = vcmask 1044480   ;;  %v461_v13 = vmov 0   ;;  %vm239_vm12 = vcmask 1046528   ;;  %vm224_vm14 = vcmask 1045504  }
   0x4   :  { %vm52_vm0 = vcmp.lt.s32.totalorder %v508_v14, 126  ;;  %vm104_vm1 = vcmp.lt.s32.totalorder %v508_v14, 96  ;;  %vm91_vm2 = vcmp.lt.s32.totalorder %v508_v14, 110  ;;  %vm65_vm3 = vcmp.lt.s32.totalorder %v508_v14, 112  ;;  %451 = vset.pattern.permute.xlu1 %v461_v13  ;;  %452 = vset.pattern.permute.xlu0 %v461_v13 }
   0x5   :  { %vm78_vm5 = vcmp.lt.s32.totalorder %v508_v14, 111  ;;  %vm117_vm6 = vcmp.lt.s32.totalorder %v508_v14, 95  ;;  %vm130_vm8 = vcmp.lt.s32.totalorder %v508_v14, 94  ;;  %vm39_vm13 = vcmp.lt.s32.totalorder %v508_v14, 127 }
   0x6   :  { %vm261_vm15 = vcmask 220160  }
   0x9   :  { %v488_v2 = vld.sshfl [vmem:[#allocation1] sm:$0xff pattern:$0x75316420]  ;;  %v490_v3 = vld.sshfl [vmem:[#allocation1 + $0x8] sm:$0xff pattern:$0x75316420] }
   0xa   :  { %24 = vst [vmem:[#allocation1] ss:$2 sm:$0xff] %v366_v1  ;;  %v255_v1 = vld [vmem:[%s707_s2] sm:$0x3f] }
  0x11   :  { %v492_v4 = vld.sshfl [vmem:[#allocation1] sm:$0xff pattern:$0x75316420]  ;;  %v496_v6 = vld.sshfl [vmem:[#allocation1 + $0x8] sm:$0xff pattern:$0x75316420] }
  0x12   :  { %v396_v5 = vpack.i.bf16 %v492_v4, %v488_v2  ;;  %v401_v7 = vpack.i.bf16 %v490_v3, %v496_v6 }
  0x14   :  { %397 = vrot.lane.b32.xlu1 %v396_v5, %s453_s16  ;;  %387 = vrot.lane.b32.xlu0 %v396_v5, %s454_s17 }
  0x15   :  { %407 = vrot.lane.b32.xlu2 %v396_v5, %s455_s18 }
  0x1c   :  { %402 = vrot.lane.b32.xlu1 %v401_v7, %s453_s16  ;;  %392 = vrot.lane.b32.xlu0 %v401_v7, %s454_s17 }
  0x1d   :  { %412 = vrot.lane.b32.xlu2 %v401_v7, %s455_s18 }
  0x24   :  { %422 = vrot.lane.b32.xlu1 %v401_v7, %s456_s0  ;;  %417 = vrot.lane.b32.xlu0 %v396_v5, %s456_s0 }
  0x25   :  { %427 = vrot.lane.b32.xlu2 %v396_v5, %s457_s19 }
  0x2c   :  { %437 = vrot.lane.b32.xlu1 %v396_v5, %s458_s20  ;;  %432 = vrot.lane.b32.xlu0 %v401_v7, %s457_s19 }
  0x2d   :  { %442 = vrot.lane.b32.xlu2 %v401_v7, %s458_s20 }
  0x34   :  { %126 = vrot.lane.b32.xlu1 %v492_v4, %s459_s21  ;;  %122 = vrot.lane.b32.xlu0 %v488_v2, %s459_s21 }
  0x35   :  { %128 = vrot.lane.b32.xlu2 %v496_v6, %s459_s21 }
  0x3c   :  { %447 = vrot.lane.b32.xlu0 %v396_v5, %s460_s22  ;;  %35 = vrot.lane.b32.xlu1 %v496_v6, %s460_s22 }
  0x3d   :  { %124 = vrot.lane.b32.xlu2 %v490_v3, %s459_s21 }
  0x44   :  { %31 = vrot.lane.b32.xlu0 %v490_v3, %s460_s22  ;;  %258 = vperm.xlu1 %451, %v255_v1  }
  0x6f   :  { %v408_v8 = vpop.permute.xlu2 %407 }
  0x70   :  { %v410_v15 = vunpack.i.h.bf16 %v408_v8  ;;  %v409_v16 = vunpack.i.l.bf16 %v408_v8 }
  0x77   :  { %v413_v9 = vpop.permute.xlu2 %412 }
  0x78   :  { %v415_v17 = vunpack.i.h.bf16 %v413_v9  ;;  %v414_v18 = vunpack.i.l.bf16 %v413_v9 }
  0x7a   :  { %v513_v22 = vsel %vm52_vm0, %v410_v15, %v414_v18  ;;  %v515_v23 = vsel %vm52_vm0, %v415_v17, %v410_v15  ;;  %v517_v24 = vsel %vm52_vm0, %v409_v16, %v415_v17  ;;  %v519_v25 = vsel %vm52_vm0, %v414_v18, %v409_v16 }
  0x7b   :  { %v151_v29 = vrot.slane %v517_v24, 2  ;;  %v152_v30 = vrot.slane %v515_v23, 2  ;;  %v153_v31 = vrot.slane %v513_v22, 2  ;;  %v154_v33 = vrot.slane %v519_v25, 2 }
  0x7f   :  { %v506_v10 = vpop.permute.xlu2 %427 }
  0x80   :  { %v430_v40 = vunpack.i.h.bf16 %v506_v10  ;;  %v429_v41 = vunpack.i.l.bf16 %v506_v10 }
  0x86   :  { %v398_v11 = vpop.permute.xlu1 %397  ;;  %v388_v12 = vpop.permute.xlu0 %387 }
  0x87   :  { %v511_v21 = vpop.permute.xlu2 %442  ;;  %v400_v34 = vunpack.i.h.bf16 %v398_v11  ;;  %v399_v35 = vunpack.i.l.bf16 %v398_v11  ;;  %v390_v36 = vunpack.i.h.bf16 %v388_v12  ;;  %v389_v39 = vunpack.i.l.bf16 %v388_v12 }
  0x88   :  { %v445_v51 = vunpack.i.h.bf16 %v511_v21  ;;  %v444_v58 = vunpack.i.l.bf16 %v511_v21 }
  0x8e   :  { %v403_v19 = vpop.permute.xlu1 %402  ;;  %v393_v20 = vpop.permute.xlu0 %392 }
  0x8f   :  { %v405_v26 = vunpack.i.h.bf16 %v403_v19  ;;  %v404_v27 = vunpack.i.l.bf16 %v403_v19  ;;  %v394_v28 = vunpack.i.l.bf16 %v393_v20  ;;  %v395_v32 = vunpack.i.h.bf16 %v393_v20  ;;  %v553_v54 = vpop.permute.xlu2 %128 }
  0x91   :  { %v105_v42 = vsel %vm104_vm1, %v400_v34, %v404_v27  ;;  %v106_v43 = vsel %vm104_vm1, %v405_v26, %v400_v34  ;;  %v107_v44 = vsel %vm104_vm1, %v399_v35, %v405_v26  ;;  %v539_v45 = vsel %vm91_vm2, %v390_v36, %v394_v28 }
  0x92   :  { %v544_v46 = vsel %vm91_vm2, %v395_v32, %v390_v36  ;;  %v548_v47 = vsel %vm91_vm2, %v389_v39, %v395_v32  ;;  %v108_v50 = vsel %vm104_vm1, %v404_v27, %v399_v35  ;;  %v199_v55 = vrot.slane %v107_v44, 6 }
  0x93   :  { %v200_v56 = vrot.slane %v106_v43, 6  ;;  %v557_v57 = vsel %vm91_vm2, %v394_v28, %v389_v39  ;;  %v201_v59 = vrot.slane %v105_v42, 6  ;;  %v187_v60 = vrot.slane %v548_v47, 1 }
  0x94   :  { %v188_v61 = vrot.slane %v544_v46, 1  ;;  %v189_v62 = vrot.slane %v539_v45, 1  ;;  %v202_v63 = vrot.slane %v108_v50, 6  ;;  %v190_v5 = vrot.slane %v557_v57, 1 }
  0x95   :  { %v245_v20 = vsel %vm244_vm4, %v187_v60, %v199_v55 }
  0x96   :  { %v423_v37 = vpop.permute.xlu1 %422  ;;  %v418_v38 = vpop.permute.xlu0 %417  ;;  %v246_v21 = vsel %vm244_vm4, %v188_v61, %v200_v56  ;;  %v247_v26 = vsel %vm244_vm4, %v189_v62, %v201_v59 }
  0x97   :  { %v425_v48 = vunpack.i.h.bf16 %v423_v37  ;;  %v419_v49 = vunpack.i.l.bf16 %v418_v38  ;;  %v424_v52 = vunpack.i.l.bf16 %v423_v37  ;;  %v420_v53 = vunpack.i.h.bf16 %v418_v38 }
  0x98   :  { %v248_v38 = vsel %vm244_vm4, %v190_v5, %v202_v63 }
  0x99   :  { %v68_v0 = vsel %vm65_vm3, %v419_v49, %v425_v48  ;;  %v66_v7 = vsel %vm65_vm3, %v420_v53, %v424_v52  ;;  %v67_v8 = vsel %vm65_vm3, %v425_v48, %v420_v53  ;;  %v69_v9 = vsel %vm65_vm3, %v424_v52, %v419_v49 }
  0x9a   :  { %v163_v19 = vrot.slane %v68_v0, 7  ;;  %v164_v27 = vrot.slane %v67_v8, 7  ;;  %v165_v35 = vrot.slane %v66_v7, 7  ;;  %v166_v36 = vrot.slane %v69_v9, 7 }
  0x9c   :  { %v230_v52 = vsel %vm229_vm7, %v151_v29, %v163_v19  ;;  %v233_v0 = vsel %vm229_vm7, %v154_v33, %v166_v36 }
  0x9e   :  { %v438_v11 = vpop.permute.xlu1 %437  ;;  %v433_v12 = vpop.permute.xlu0 %432 }
  0x9f   :  { %v440_v15 = vunpack.i.h.bf16 %v438_v11  ;;  %v439_v16 = vunpack.i.l.bf16 %v438_v11  ;;  %v435_v17 = vunpack.i.h.bf16 %v433_v12  ;;  %v434_v18 = vunpack.i.l.bf16 %v433_v12 }
  0xa1   :  { %v79_v28 = vsel %vm78_vm5, %v440_v15, %v444_v58  ;;  %v80_v32 = vsel %vm78_vm5, %v445_v51, %v440_v15  ;;  %v81_v34 = vsel %vm78_vm5, %v439_v16, %v445_v51  ;;  %v82_v37 = vsel %vm78_vm5, %v444_v58, %v439_v16  ;;  %v125_v51 = vpop.permute.xlu2 %124 }
  0xa2   :  { %v120_v39 = vsel %vm117_vm6, %v429_v41, %v435_v17  ;;  %v119_v42 = vsel %vm117_vm6, %v435_v17, %v430_v40  ;;  %v118_v43 = vsel %vm117_vm6, %v430_v40, %v434_v18  ;;  %v121_v44 = vsel %vm117_vm6, %v434_v18, %v429_v41 }
  0xa3   :  { %v176_v48 = vrot.slane %v80_v32, 4  ;;  %v177_v49 = vrot.slane %v79_v28, 4  ;;  %v175_v50 = vrot.slane %v81_v34, 4  ;;  %v178_v53 = vrot.slane %v82_v37, 4  ;;  %v254_v32 = vld [vmem:[%s708_s1] sm:$0x3f] }
  0xa4   :  { %v211_v55 = vrot.slane %v120_v39, 3  ;;  %v212_v56 = vrot.slane %v119_v42, 3  ;;  %v231_v40 = vsel %vm229_vm7, %v152_v30, %v164_v27  ;;  %v213_v59 = vrot.slane %v118_v43, 3 }
  0xa5   :  { %v214_v63 = vrot.slane %v121_v44, 3  ;;  %v232_v41 = vsel %vm229_vm7, %v153_v31, %v165_v35  ;;  %v235_v11 = vsel %vm234_vm10, %v230_v52, %v175_v50  ;;  %v236_v12 = vsel %vm234_vm10, %v231_v40, %v176_v48 }
  0xa6   :  { %v127_v58 = vpop.permute.xlu1 %126  ;;  %v123_v10 = vpop.permute.xlu0 %122  ;;  %v237_v13 = vsel %vm234_vm10, %v232_v41, %v177_v49  ;;  %v250_v15 = vsel %vm249_vm11, %v245_v20, %v211_v55  ;;  %v251_v16 = vsel %vm249_vm11, %v246_v21, %v212_v56  ;;  %v252_v17 = vsel %vm249_vm11, %v247_v26, %v213_v59 }
  0xa7   :  { %v133_v1 = vsel %vm130_vm8, %v123_v10, %v125_v51  ;;  %v132_v7 = vsel %vm130_vm8, %v125_v51, %v127_v58  ;;  %v131_v8 = vsel %vm130_vm8, %v127_v58, %v553_v54  ;;  %v134_v9 = vsel %vm130_vm8, %v553_v54, %v123_v10 }
  0xa8   :  { %367 = vmatpush.msk.msra.mxu0 %vm219_vm9, %v133_v1  ;;  %369 = vmatpush.msk.msra.mxu1 %vm219_vm9, %v132_v7  ;;  %v238_v54 = vsel %vm234_vm10, %v233_v0, %v178_v53  ;;  %v253_v18 = vsel %vm249_vm11, %v248_v38, %v214_v63  ;;  %v240_v19 = vsel %vm239_vm12, %v235_v11, %v187_v60 }
  0xa9   :  { %371 = vmatpush.msk.msra.mxu2 %vm219_vm9, %v131_v8  ;;  %373 = vmatpush.msk.msra.mxu3 %vm219_vm9, %v134_v9  ;;  %v241_v20 = vsel %vm239_vm12, %v236_v12, %v188_v61  ;;  %v242_v21 = vsel %vm239_vm12, %v237_v13, %v189_v62  ;;  %v243_v26 = vsel %vm239_vm12, %v238_v54, %v190_v5 }
  0xaa   :  { %290 = vmatpush.msra.mxu0 %v250_v15  ;;  %310 = vmatpush.msra.mxu1 %v251_v16 }
  0xab   :  { %330 = vmatpush.msra.mxu2 %v252_v17  ;;  %350 = vmatpush.msra.mxu3 %v253_v18 }
  0xac   :  { %291 = vmatpush.msra.mxu0 %v240_v19  ;;  %311 = vmatpush.msra.mxu1 %v241_v20 }
  0xad   :  { %331 = vmatpush.msra.mxu2 %v242_v21  ;;  %351 = vmatpush.msra.mxu3 %v243_v26 }
  0xae   :  { %v448_v27 = vpop.permute.xlu0 %447  ;;  %v36_v47 = vpop.permute.xlu1 %35 }
  0xaf   :  { %v450_v60 = vunpack.i.h.bf16 %v448_v27  ;;  %v449_v46 = vunpack.i.l.bf16 %v448_v27 }
  0xb1   :  { %v40_v61 = vsel %vm39_vm13, %v450_v60, %v36_v47  ;;  %v43_v45 = vsel %vm39_vm13, %v36_v47, %v449_v46 }
  0xb2   :  { %v141_v28 = vrot.slane %v40_v61, 5  ;;  %v142_v62 = vrot.slane %v43_v45, 5 }
  0xb4   :  { %v222_v57 = vsel %vm219_vm9, %v492_v4, %v141_v28  ;;  %v223_v5 = vsel %vm219_vm9, %v496_v6, %v142_v62 }
  0xb5   :  { %v227_v34 = vsel %vm224_vm14, %v222_v57, %v153_v31  ;;  %v228_v35 = vsel %vm224_vm14, %v223_v5, %v154_v33 }
  0xb6   :  { %v32_v36 = vpop.permute.xlu0 %31  ;;  %332 = vmatpush.msra.mxu2 %v227_v34  ;;  %352 = vmatpush.msra.mxu3 %v228_v35  ;;  %v259_v38 = vpop.permute.xlu1 %258 }
  0xb7   :  { %v41_v4 = vsel %vm39_vm13, %v32_v36, %v450_v60  ;;  %v42_v6 = vsel %vm39_vm13, %v449_v46, %v32_v36  ;;  %372 = vmatmul.msk.f32.vlgmr.msra.gmra.mxu2 %vm261_vm15, %v254_v32  ;;  %374 = vmatmul.msk.f32.vlgmr.msra.gmra.mxu3 %vm261_vm15, %v254_v32 }
  0xb8   :  { %v139_v22 = vrot.slane %v42_v6, 5  ;;  %v140_v37 = vrot.slane %v41_v4, 5 }
  0xba   :  { %v220_v25 = vsel %vm219_vm9, %v488_v2, %v139_v22  ;;  %v221_v31 = vsel %vm219_vm9, %v490_v3, %v140_v37 }
  0xbb   :  { %v225_v33 = vsel %vm224_vm14, %v220_v25, %v151_v29  ;;  %v226_v14 = vsel %vm224_vm14, %v221_v31, %v152_v30 }
  0xbc   :  { %292 = vmatpush.msra.mxu0 %v225_v33  ;;  %312 = vmatpush.msra.mxu1 %v226_v14 }
  0xbd   :  { %368 = vmatmul.msk.f32.vlgmr.msra.gmra.mxu0 %vm261_vm15, %v254_v32  ;;  %370 = vmatmul.msk.f32.vlgmr.msra.gmra.mxu1 %vm261_vm15, %v254_v32 }
 0x13a   :  { %v294_v39 = vpop.f32.mrf.mxu0  ;;  %v314_v2 = vpop.f32.mrf.mxu1 }
 0x13b   :  { %v295_v42 = vadd.f32 %v294_v39, %v259_v38  ;;  %v315_v43 = vadd.f32 %v314_v2, %v259_v38  ;;  %v334_v3 = vpop.f32.mrf.mxu2  ;;  %v354_v44 = vpop.f32.mrf.mxu3 }
 0x13c   :  { %v335_v24 = vadd.f32 %v334_v3, %v259_v38  ;;  %v355_v48 = vadd.f32 %v354_v44, %v259_v38 }
 0x13d   :  { %357 = vst [vmem:[%s709_s3] sm:$0x3f] %v295_v42 }
 0x13e   :  { %358 = vst [vmem:[%s709_s3 + $0x8] sm:$0x3f] %v315_v43 }
 0x13f   :  { %375 = vst [vmem:[%s709_s3 + $0x10] sm:$0x3f] %v335_v24 }
 0x140   :  { %376 = vst [vmem:[%s709_s3 + $0x18] sm:$0x3f] %v355_v48 }

</bundles_post_ra>
